<compile_context>
chip_gen: v7x
topology: tpu7x:2x2x1
jax: 0.10.0
libtpu: 0.0.40
codegen_flags: <defaults>
</compile_context>

<pallas_src>
import jax
import jax.numpy as jnp
from jax.experimental import pallas as pl
from jax.experimental.pallas import tpu as pltpu


def _lssm_kernel(A_ref, bias_ref, xT_ref, dxT_ref):
    # One MXU matmul per lane tile: DX^T tile = A @ X^T tile, plus the constant
    # bias column broadcast across lanes.  Output last dim is the lane tile
    # (>=128), so stores are full-width (no vst.msk).
    acc = jnp.dot(A_ref[...], xT_ref[...], preferred_element_type=jnp.float32)
    dxT_ref[...] = (acc + bias_ref[...]).astype(dxT_ref.dtype)


def _round_up(x, m):
    return (x + m - 1) // m * m


def make_lssm_forward(A, B, d):
    """Build forward fns for LSSMWithConstantInputs.

    Precomputes the constant bias B @ d once (module-init time).

    Returns (forward, forward_batched):
      forward(t, x):         x (n,) -> dx (n,)       [exact torch semantics,
                                                       plain XLA: launch-bound]
      forward_batched(t, X): X (batch, n) -> (batch, n)  [Pallas kernel; each
                              row is an independent state.  Stack many states /
                              time-steps here to amortize launch + A DMA.]
    """
    A_f32 = jnp.asarray(A, jnp.float32)                                 # (n, n)
    bias_col = (jnp.asarray(B, jnp.float32)
                @ jnp.asarray(d, jnp.float32).reshape(-1, 1))           # (n, 1)
    bias_vec = bias_col.reshape(-1)                                     # (n,)
    n = A_f32.shape[0]

    def _call(xT, tile):
        # xT: (n, Bp) with Bp % tile == 0, tile % 128 == 0.
        Bp = xT.shape[1]
        grid = (Bp // tile,)
        cost = pl.CostEstimate(
            flops=2 * n * n * Bp,
            transcendentals=0,
            bytes_accessed=4 * (n * n + n + 2 * n * Bp),
        )
        return pl.pallas_call(
            _lssm_kernel,
            out_shape=jax.ShapeDtypeStruct((n, Bp), jnp.float32),
            grid=grid,
            in_specs=[
                # A: constant block index across the grid -> DMA'd once,
                # stays VMEM-resident.
                pl.BlockSpec((n, n), lambda j: (0, 0)),
                # bias column: constant block index, stays resident.
                pl.BlockSpec((n, 1), lambda j: (0, 0)),
                # X^T: one lane tile per grid step.
                pl.BlockSpec((n, tile), lambda j: (0, j)),
            ],
            out_specs=pl.BlockSpec((n, tile), lambda j: (0, j)),
            compiler_params=pltpu.CompilerParams(
                dimension_semantics=("parallel",),   # v7x: split tiles over 2 TCs
            ),
            cost_estimate=cost,
        )(A_f32, bias_col, xT)

    def forward(t, x):
        # Exact torch semantics for a single state.  Per the perf review this
        # tiny matvec is launch-bound, so it is left to XLA (no pallas_call).
        del t  # unused, as in the reference module
        x = jnp.asarray(x, jnp.float32).reshape(-1)
        return A_f32 @ x + bias_vec                                     # (n,)

    def forward_batched(t, X):
        # Many independent states (or ODE time-steps) in one Pallas call.
        del t
        X = jnp.asarray(X, jnp.float32).reshape(-1, n)                  # (batch, n)
        batch = X.shape[0]
        # 256-wide lane tile fills the v6e/v7x MXU; 128 suffices for v5e and
        # for small batches.  Pad batch up to a tile multiple (zeros), then
        # transpose so the batch axis is the lane (last) dim.
        tile = 256 if batch >= 256 else 128
        Bp = _round_up(batch, tile)
        XT = jnp.pad(X, ((0, Bp - batch), (0, 0))).T                    # (n, Bp)
        dxT = _call(XT, tile)                                           # (n, Bp)
        return dxT[:, :batch].T                                         # (batch, n)

    return forward, forward_batched


if __name__ == "__main__":
    # Deterministic synthetic parameters (the torch module's __init__ just
    # stores A, B, C, D, d; C and D are unused in forward).
    n = 32   # state dimension
    m = 5    # number of constant inputs (data_train.values[:, :5] -> 5 cols)
    p = 4    # output dim for C/D (unused in forward)

    key = jax.random.PRNGKey(0)
    kA, kB, kC, kD, kd, kx, kX = jax.random.split(key, 7)
    A = jax.random.normal(kA, (n, n), dtype=jnp.float32) * 0.1
    B = jax.random.normal(kB, (n, m), dtype=jnp.float32) * 0.1
    C = jax.random.normal(kC, (p, n), dtype=jnp.float32)   # unused in forward
    D = jax.random.normal(kD, (p, m), dtype=jnp.float32)   # unused in forward
    d_const = jax.random.normal(kd, (m, 1), dtype=jnp.float32)
    x = jax.random.normal(kx, (n,), dtype=jnp.float32)
    t = jnp.float32(0.0)

    forward, forward_batched = make_lssm_forward(A, B, d_const)

    # --- single-state forward (exact torch semantics; XLA path per review) ---
    dx = jax.block_until_ready(forward(t, x))
    dx_ref = (A @ x.reshape(-1, 1) + B @ d_const).reshape(-1)
    assert dx.shape == (n,)
    assert jnp.allclose(dx, dx_ref, atol=1e-5, rtol=1e-5)

    # --- batched states through the Pallas kernel -----------------------------
    # batch = 300 exercises both padding (300 -> 512) and a 2-step grid with a
    # 256-wide lane tile.  Row 0 is set to x so the Pallas path is checked
    # against the exact single-state semantics too.
    batch = 300
    X = jax.random.normal(kX, (batch, n), dtype=jnp.float32)
    X = X.at[0].set(x)
    DX = jax.block_until_ready(forward_batched(t, X))
    DX_ref = X @ A.T + (B @ d_const).reshape(1, -1)
    assert DX.shape == (batch, n)
    assert jnp.allclose(DX, DX_ref, atol=1e-4, rtol=1e-4)
    assert jnp.allclose(DX[0], dx_ref, atol=1e-4, rtol=1e-4)

    print("KERNEL_OK")
</pallas_src>

<mosaic_0001>
module attributes {stable_mosaic.version = 11 : i64} {
  func.func @_lssm_kernel(%arg0: i32, %arg1: memref<32x32xf32, #tpu.memory_space<vmem>>, %arg2: memref<32x1xf32, #tpu.memory_space<vmem>>, %arg3: memref<32x256xf32, #tpu.memory_space<vmem>>, %arg4: memref<32x256xf32, #tpu.memory_space<vmem>>) attributes {dimension_semantics = [#tpu.dimension_semantics<parallel>], iteration_bounds = array<i64: 2>, scalar_prefetch = 0 : i64, scratch_operands = 0 : i64, tpu.core_type = #tpu.core_type<tc>, window_params = [{pipeline_mode = #tpu.pipeline_mode<synchronous>, transform_indices = @transform_0, window_bounds = array<i64: 32, 32>}, {pipeline_mode = #tpu.pipeline_mode<synchronous>, transform_indices = @transform_1, window_bounds = array<i64: 32, 1>}, {transform_indices = @transform_2, window_bounds = array<i64: 32, 256>}, {transform_indices = @transform_3, window_bounds = array<i64: 32, 256>}]} {
    %c0 = arith.constant 0 : index
    %c0_0 = arith.constant 0 : index
    %0 = vector.load %arg1[%c0, %c0_0] : memref<32x32xf32, #tpu.memory_space<vmem>>, vector<32x32xf32>
    %c0_1 = arith.constant 0 : index
    %c0_2 = arith.constant 0 : index
    %1 = vector.load %arg3[%c0_1, %c0_2] : memref<32x256xf32, #tpu.memory_space<vmem>>, vector<32x256xf32>
    %cst = arith.constant dense<0.000000e+00> : vector<32x256xf32>
    %2 = tpu.matmul %0, %1, %cst {dimension_numbers = #tpu.dot_dimension_numbers<[1], [0], [0], [1], [0, 0, 1, 1], [], []>} : vector<32x32xf32>, vector<32x256xf32>, vector<32x256xf32> -> vector<32x256xf32>
    %c0_3 = arith.constant 0 : index
    %c0_4 = arith.constant 0 : index
    %3 = vector.load %arg2[%c0_3, %c0_4] : memref<32x1xf32, #tpu.memory_space<vmem>>, vector<32x1xf32>
    %4 = vector.broadcast %3 : vector<32x1xf32> to vector<32x256xf32>
    %5 = arith.addf %2, %4 : vector<32x256xf32>
    %c0_5 = arith.constant 0 : index
    %c0_6 = arith.constant 0 : index
    %6 = vector.load %arg4[%c0_5, %c0_6] : memref<32x256xf32, #tpu.memory_space<vmem>>, vector<32x256xf32>
    tpu.vector_store %arg4[%c0_5, %c0_6], %5 {strides = array<i32>} : memref<32x256xf32, #tpu.memory_space<vmem>>, vector<32x256xf32>,
    return
  }
  func.func @transform_0(%arg0: i32) -> (i32, i32) {
    %c0_i32 = arith.constant 0 : i32
    %c0_i32_0 = arith.constant 0 : i32
    %c0_i32_1 = arith.constant 0 : i32
    return %c0_i32, %c0_i32_0 : i32, i32
  }
  func.func @transform_1(%arg0: i32) -> (i32, i32) {
    %c0_i32 = arith.constant 0 : i32
    %c0_i32_0 = arith.constant 0 : i32
    %c0_i32_1 = arith.constant 0 : i32
    return %c0_i32, %c0_i32_0 : i32, i32
  }
  func.func @transform_2(%arg0: i32) -> (i32, i32) {
    %c0_i32 = arith.constant 0 : i32
    %c0_i32_0 = arith.constant 0 : i32
    return %c0_i32, %arg0 : i32, i32
  }
  func.func @transform_3(%arg0: i32) -> (i32, i32) {
    %c0_i32 = arith.constant 0 : i32
    %c0_i32_0 = arith.constant 0 : i32
    return %c0_i32, %arg0 : i32, i32
  }
}

</mosaic_0001>

<bundles_post_ra>
// kernel: tpu_custom_call.1
= control target key start
LH: loop header
LB: loop body
LE: loop exit
PB: predicated region body
PF: predicated region fallthrough
CT: control target
= control target key end

     0   :  { %8 = vsyncpa [#allocation3], 0  ;;  %s832_s0 = inlined_call_operand.vmem [shape: f32[32,32], index: 0, kind: input, shape index: {}]   ;;  %s833_s1 = inlined_call_operand.vmem [shape: f32[32,1], index: 1, kind: input, shape index: {}]   ;;  %s834_s2 = inlined_call_operand.hbm [shape: f32[32,512], index: 2, kind: input, shape index: {}]   ;;  %s835_s3 = inlined_call_operand.hbm [shape: f32[32,512], index: 3, kind: output, shape index: {}]  }
   0x1   :  { %10 = vsyncpa [#allocation3 + $0x1], 0 }
   0x2   :  { %11 = vsyncpa [#allocation4], 0 }
   0x3   :  { %13 = vsyncpa [#allocation4 + $0x1], 0  ;;  %s640_s12 = smov 0   ;;  %s642_s13 = smov 0  }
   0x4   :  { %s644_s14 = smov 0   ;;  %s646_s15 = smov 0  }
   0x5 LB: > { %s661_s16 = sadd.s32 4294967295, %s608_s15   ;;  %s424_s17 = sadd.s32 4294967294, %s608_s15   ;;  %s608_s15 = sphi %s646_s15, %s849_s15   ;;  %s604_s14 = sphi %s644_s14, %s848_s14   ;;  %s600_s13 = sphi %s642_s13, %s847_s13   ;;  %s596_s12 = sphi %s640_s12, %s846_s12  }
   0x6   : > { %s665_s18 = sadd.s32 1, %s608_s15   ;;  %s68_s19 = sadd.s32 1, %s604_s14 }
   0x7   : > { %s65_s20 = ssub.s32 %s608_s15, %s665_s18  ;;  %p75_p0 = scmp.ne.s32.totalorder %s604_s14, %s600_s13 }
   0x8   : > { %p66_p1 = scmp.eq.s32.totalorder %s65_s20, 0  ;;  %p76_p2 = scmp.eq.s32.totalorder %s608_s15, 0 }
   0x9   : > { %p81_p3 = scmp.ne.s32.totalorder %s600_s13, %s596_s12  ;;  %p82_p4 = scmp.eq.s32.totalorder %s661_s16, 0 }
   0xa   : > { %s677_s21 = scalar_select %p66_p1, %s604_s14, %s68_s19  }
   0xb   : > { %p679_p5 = por %p76_p2, %p75_p0  ;;  %p683_p6 = por %p82_p4, %p81_p3 }
   0xc   : > { %p105_p7 = scmp.eq.s32.totalorder %s661_s16, 1  ;;  %p111_p8 = scmp.eq.s32.totalorder %s424_s17, 1 }
   0xd   : > { %p468_p10 = scmp.lt.s32.totalorder %s608_s15, 2  ;;  %s137_s26 = sand.u32 1, %s604_s14  }
   0xe   : > { %p690_p11 = por %p105_p7, %p75_p0  ;;  %p694_p12 = por %p111_p8, %p81_p3 }
   0xf   : > { %s442_s27 = sshll.u32 %s608_s15, 8  ;;  %s427_s28 = sshll.u32 %s137_s26, 6 }
  0x10   : > { %s839_s24 = scalar_select %p690_p11, 1, 0 }
  0x11   : > { %s840_s25 = scalar_select %p694_p12, 1, 0 }
  0x12   : > { %s703_s4 = scalar_lea.hbm %s834_s2, %s442_s27  ;;  %s141_s5 = scalar_lea.vmem [#allocation2], %s427_s28 }
  0x13   : > { %s148_s6 = sshll.u32 %s141_s5, 4  ;;  %p707_p13 = pnand %p468_p10, %p679_p5  ;;  %s711_s6 = int_to_ptr.vmem [resolvable:$true] %s148_s6 }
  0x14   : > { %s714_s8 = scalar_lea.sflag [#allocation3], %s137_s26  ;;  %s512_s9 = scalar_lea.hbm %s703_s4, 1024 }
  0x15   : > { %p513_p1 = scmp.ne.s32.totalorder %s703_s4, %s512_s9  ;;  %p514_p2 = pneg %p707_p13 }
  0x16   : > { %s517_s17 = scalar_lea.hbm %s834_s2, 2048  ;;  %p518_p5 = scmp.lt.u32.totalorder %s703_s4, %s834_s2 }
  0x17   : > { %p515_p3 = pnand %p514_p2, %p513_p1  ;;  %p519_p7 = scmp.lt.u32.totalorder %s517_s17, %s512_s9 }
  0x18   : > { %p521_p10 = scmp.lt.u32.totalorder %s512_s9, %s703_s4 }
  0x19   : > { %p516_p4 = pneg %p515_p3  ;;  %p520_p8 = por %p519_p7, %p518_p5 }
  0x1b   : > { %p522_p9 = por %p521_p10, %p520_p8 }
  0x1d   : > { %p523_p0 = pnand %p522_p9, %p516_p4 }
  0x1f   : > { %526 = shalt.err (!%p523_p0)
}
  0x20   : > { %s527_s22 = scalar_lea.vmem %s711_s6, 1024  ;;  %s610_s26 = smov [#allocation2]  }
  0x21   : > { %p528_p1 = scmp.ne.s32.totalorder %s711_s6, %s527_s22  ;;  %s532_s27 = sshll.u32 %s610_s26, 4  ;;  %s533_s27 = int_to_ptr.vmem [resolvable:$false] %s532_s27 }
  0x22   : > { %s534_s28 = scalar_lea.vmem %s533_s27, 2048  ;;  %p535_p11 = scmp.lt.s32.totalorder %s711_s6, %s533_s27 }
  0x23   : > { %p530_p3 = pnand %p528_p1, %p514_p2  ;;  %p536_p5 = scmp.lt.s32.totalorder %s534_s28, %s527_s22 }
  0x25   : > { %p531_p12 = pneg %p530_p3  ;;  %p537_p7 = por %p536_p5, %p535_p11 }
  0x27   : > { %p538_p8 = pnand %p537_p7, %p531_p12 }
  0x29   : > { %541 = shalt.err (!%p538_p8)
}
  0x2a   : > { %s611_s29 = smov 512   ;;  %s612_s30 = smov 256  }
  0x2b   : > { %s613_s5 = smov 16   ;;  %p156_p9 = scmp.lt.s32.totalorder %s608_s15, 3 }
  0x2c   : > { %463 = dma.hbm_to_vmem [thread:$0]  (!%p707_p13), %s703_s4, 1024, %s711_s6, %s714_s8, %s611_s29, %s612_s30, %s613_s5  }
  0x2d   : > { %p842_p0 = scmp.ge.s32.totalorder %s608_s15, 1 }
  0x2f   : > { %p157_p2 = pnand %p842_p0, %p156_p9 }
  0x30   : > { %s746_s9 = sand.u32 (!%p157_p2), 1, %s600_s13  }
  0x31   : > { %160 = sbr.rel (%p157_p2) target bundleno = 303 (0x12f), region = 32  ;;  %s431_s10 = sshll.u32 (!%p157_p2), %s746_s9, 6 }
  0x32   : > { %s163_s11 = scalar_lea.sflag (!%p157_p2), [#allocation3], %s746_s9  ;;  %s166_s17 = scalar_lea.vmem (!%p157_p2), [#allocation2], %s431_s10 }
  0x38   : > { %587 = dma.done.wait (%p683_p6), %s163_s11, 1024  }
  0x39   : > { %589 = vsyncadd (%p683_p6), %s163_s11, 4294966272  ;;  %v614_v0 = vmov 0.0   ;;  %v615_v1 = vmov 0   ;;  %v196_v2 = vld [vmem:[%s166_s17 + $0x8] sm:$0xff]  ;;  %v198_v3 = vld [vmem:[%s166_s17 + $0x18] sm:$0xff]  ;;  %vm227_vm0 = vcmask 261120  }
  0x3a   : > { %304 = vmatprep.mubr.f32.mxu0 %v614_v0  ;;  %316 = vmatprep.mubr.f32.mxu1 %v614_v0  ;;  %v195_v4 = vld [vmem:[%s166_s17] sm:$0xff]  ;;  %v444_v5 = vpack.c.bf16 %v198_v3, %v196_v2  ;;  %v197_v6 = vld [vmem:[%s166_s17 + $0x10] sm:$0xff]  ;;  %v200_v7 = vld [vmem:[%s166_s17 + $0x28] sm:$0xff]  ;;  %s188_s23 = scalar_lea.vmem [#allocation5], %s431_s10  ;;  %s443_s6 = sshll.u32 %s661_s16, 8 }
  0x3b   : > { %511 = vset.pattern.permute.xlu1 %v615_v1  ;;  %510 = vset.pattern.permute.xlu0 %v615_v1  ;;  %v202_v8 = vld [vmem:[%s166_s17 + $0x38] sm:$0xff]  ;;  %v446_v9 = vpack.c.bf16 %v197_v6, %v195_v4  ;;  %v199_v11 = vld [vmem:[%s166_s17 + $0x20] sm:$0xff]  ;;  %v201_v12 = vld [vmem:[%s166_s17 + $0x30] sm:$0xff]  ;;  %s351_s4 = sshll.u32 %s188_s23, 4  ;;  %s788_s7 = scalar_lea.hbm %s835_s3, %s443_s6  ;;  %s783_s4 = int_to_ptr.vmem [resolvable:$true] %s351_s4 }
  0x3c   : > { %v448_v10 = vpack.c.bf16 %v202_v8, %v200_v7  ;;  %445 = vmatprep.subr.bf16.mxu0 %v444_v5  ;;  %452 = vmatprep.subr.bf16.mxu1 %v444_v5  ;;  %v450_v13 = vpack.c.bf16 %v201_v12, %v199_v11  ;;  %v205_v14 = vld [vmem:[%s833_s1 + $0x10] sm:$0xff]  ;;  %v203_v15 = vld [vmem:[%s833_s1] sm:$0xff]  ;;  %v206_v16 = vld [vmem:[%s833_s1 + $0x18] sm:$0xff]  ;;  %s338_s8 = scalar_lea.sflag [#allocation4], %s746_s9  ;;  %s542_s19 = scalar_lea.vmem %s783_s4, 1024 }
  0x3d   : > { %447 = vmatpush1.bf16.msra.mxu0 %v446_v9  ;;  %454 = vmatpush1.bf16.msra.mxu1 %v446_v9  ;;  %v204_v17 = vld [vmem:[%s833_s1 + $0x8] sm:$0xff]  ;;  %v191_v18 = vld [vmem:[%s832_s0] sm:$0xff]  ;;  %v193_v19 = vld [vmem:[%s832_s0 + $0x10] sm:$0xff]  ;;  %p543_p6 = scmp.ne.s32.totalorder %s783_s4, %s542_s19  ;;  %p843_p11 = scmp.ne.s32.totalorder %s839_s24, 0 }
  0x3e   : > { %449 = vmatprep.subr.bf16.mxu0 %v448_v10  ;;  %453 = vmatprep.subr.bf16.mxu1 %v448_v10  ;;  %v192_v20 = vld [vmem:[%s832_s0 + $0x8] sm:$0xff]  ;;  %v194_v21 = vld [vmem:[%s832_s0 + $0x18] sm:$0xff]  ;;  %s616_s20 = smov [#allocation5]  }
  0x3f   : > { %219 = vperm.xlu1 %511, %v205_v14   ;;  %209 = vperm.xlu0 %510, %v203_v15   ;;  %p544_p12 = pnand %p543_p6, %p843_p11  ;;  %s546_s22 = sshll.u32 %s616_s20, 4  ;;  %s547_s22 = int_to_ptr.vmem [resolvable:$false] %s546_s22 }
  0x40   : > { %s548_s26 = scalar_lea.vmem %s547_s22, 2048  ;;  %p549_p4 = scmp.lt.s32.totalorder %s783_s4, %s547_s22 }
  0x41   : > { %451 = vmatpush1.bf16.msra.mxu0 %v450_v13  ;;  %455 = vmatpush1.bf16.msra.mxu1 %v450_v13  ;;  %p545_p13 = pneg %p544_p12  ;;  %p550_p10 = scmp.lt.s32.totalorder %s548_s26, %s542_s19 }
  0x43   : > { %224 = vperm.xlu1 %511, %v206_v16   ;;  %214 = vperm.xlu0 %510, %v204_v17   ;;  %p551_p1 = por %p550_p10, %p549_p4 }
  0x44   : > { %433 = vmatmul.mubr.msk.f32.vlgmr.msra.gmra.mrb[0].mxu0 %vm227_vm0, %v191_v18  ;;  %435 = vmatmul.mubr.msk.f32.vlgmr.msra.gmra.mrb[0].mxu1 %vm227_vm0, %v193_v19 }
  0x45   : > { %310 = vmatprep.mubr.f32.mxu0 %v614_v0  ;;  %322 = vmatprep.mubr.f32.mxu1 %v614_v0  ;;  %p552_p3 = pnand %p551_p1, %p545_p13 }
  0x48   : > { %434 = vmatmul.mubr.msk.f32.gmra.mrb[2].mxu0 %vm227_vm0, %v192_v20  ;;  %436 = vmatmul.mubr.msk.f32.gmra.mrb[2].mxu1 %vm227_vm0, %v194_v21 }
  0xbe   : > { %v220_v22 = vpop.permute.xlu1 %219  ;;  %v210_v23 = vpop.permute.xlu0 %209 }
  0xc2   : > { %v225_v32 = vpop.permute.xlu1 %224  ;;  %v215_v33 = vpop.permute.xlu0 %214 }
 0x117   : > { %v306_v24 = vpop.f32.mrb[0].mxu0  ;;  %v318_v25 = vpop.f32.mrb[0].mxu1 }
 0x118   : > { %v307_v26 = vadd.f32 %v306_v24, %v210_v23  ;;  %v319_v27 = vadd.f32 %v318_v25, %v220_v22  ;;  %v308_v28 = vpop.f32.mrb[1].mxu0  ;;  %v320_v29 = vpop.f32.mrb[1].mxu1 }
 0x119   : > { %v309_v30 = vadd.f32 %v308_v28, %v210_v23  ;;  %v321_v31 = vadd.f32 %v320_v29, %v220_v22 }
 0x11a   : > { %329 = vst [vmem:[%s188_s23] sm:$0xff] %v307_v26  ;;  %333 = vst [vmem:[%s188_s23 + $0x20] sm:$0xff] %v319_v27 }
 0x11b   : > { %330 = vst [vmem:[%s188_s23 + $0x8] sm:$0xff] %v309_v30  ;;  %334 = vst [vmem:[%s188_s23 + $0x28] sm:$0xff] %v321_v31  ;;  %v312_v34 = vpop.f32.mrb[2].mxu0  ;;  %v324_v35 = vpop.f32.mrb[2].mxu1 }
 0x11c   : > { %v313_v36 = vadd.f32 %v312_v34, %v215_v33  ;;  %v325_v37 = vadd.f32 %v324_v35, %v225_v32  ;;  %v314_v38 = vpop.f32.mrb[3].mxu0  ;;  %v326_v39 = vpop.f32.mrb[3].mxu1 }
 0x11d   : > { %v315_v40 = vadd.f32 %v314_v38, %v215_v33  ;;  %v327_v41 = vadd.f32 %v326_v39, %v225_v32 }
 0x11e   : > { %331 = vst [vmem:[%s188_s23 + $0x10] sm:$0xff] %v313_v36  ;;  %335 = vst [vmem:[%s188_s23 + $0x30] sm:$0xff] %v325_v37 }
 0x11f   : > { %332 = vst [vmem:[%s188_s23 + $0x18] sm:$0xff] %v315_v40  ;;  %336 = vst [vmem:[%s188_s23 + $0x38] sm:$0xff] %v327_v41 }
 0x120   : > { %555 = shalt.err (!%p552_p3)
}
 0x121   : > { %s556_s27 = scalar_lea.hbm %s788_s7, 1024  ;;  %s560_s30 = scalar_lea.hbm %s835_s3, 2048 }
 0x122   : > { %p557_p5 = scmp.ne.s32.totalorder %s788_s7, %s556_s27  ;;  %p561_p9 = scmp.lt.u32.totalorder %s788_s7, %s835_s3 }
 0x123   : > { %p562_p0 = scmp.lt.u32.totalorder %s560_s30, %s556_s27  ;;  %p564_p6 = scmp.lt.u32.totalorder %s556_s27, %s788_s7 }
 0x124   : > { %p558_p7 = pnand %p557_p5, %p843_p11 }
 0x125   : > { %p563_p2 = por %p562_p0, %p561_p9 }
 0x126   : > { %p559_p8 = pneg %p558_p7 }
 0x127   : > { %p565_p12 = por %p564_p6, %p563_p2 }
 0x129   : > { %p566_p13 = pnand %p565_p12, %p559_p8 }
 0x12b   : > { %569 = shalt.err (!%p566_p13)
}
 0x12c   : > { %s617_s17 = smov 256   ;;  %s618_s23 = smov 512  }
 0x12d   : > { %s619_s6 = smov 16  }
 0x12e   : > { %458 = dma.vmem_to_hbm [thread:$0]  (%p843_p11), %s783_s4, 1024, %s788_s7, %s338_s8, %s617_s17, %s618_s23, %s619_s6  }
 0x12f PF: > { %s366_s10 = sand.u32 1, %s596_s12   ;;  %p844_p4 = scmp.ne.s32.totalorder %s840_s25, 0 }
 0x130   : > { %p845_p10 = scmp.ge.s32.totalorder %s608_s15, 2  ;;  %s367_s16 = scalar_lea.sflag [#allocation4], %s366_s10 }
 0x132   : > { %p465_p1 = pnand %p845_p10, %p844_p4 }
 0x134   : > { %591 = dma.done.wait (!%p465_p1), %s367_s16, 1024  }
 0x135   : > { %593 = vsyncadd (!%p465_p1), %s367_s16, 4294966272  ;;  %p16_p3 = scmp.ge.s32.totalorder %s665_s18, 4   ;;  %s846_s12 = smov %s600_s13 }
 0x136   : > { %s847_s13 = smov %s604_s14  ;;  %s848_s14 = smov %s677_s21 }
 0x137   : > { %s849_s15 = smov %s665_s18  ;;  %18 = sbr.rel (!%p16_p3) target bundleno = 5 (0x5), region = 77 }
 0x13e   :  { %372 = vsyncpa [#allocation3], 1 }
 0x13f   :  { %374 = vsyncpa [#allocation3 + $0x1], 1 }
 0x140   :  { %375 = vsyncpa [#allocation4], 1 }
 0x141   :  { %377 = vsyncpa [#allocation4 + $0x1], 1 }

</bundles_post_ra>
